<compile_context>
chip_gen: v5e
topology: v5e:2x2
jax: 0.10.0
libtpu: 0.0.40
codegen_flags: <defaults>
</compile_context>

<pallas_src>
import functools

import jax
import jax.numpy as jnp
from jax.experimental import pallas as pl
from jax.experimental.pallas import tpu as pltpu


# ---------------------------------------------------------------------------
# Kernels
# ---------------------------------------------------------------------------

def _abrelu_2d_kernel(x_ref, o_ref, *, scale):
    # x_ref block: (M, tn) -- the full reduction (M) axis is resident in VMEM.
    # alpha / M is pre-folded into `scale`, so beta = scale * sum(x, -2).
    # f32 accumulation for the sum; subtract/ReLU streams the native dtype
    # (no (M, tn) f32 block copy).
    x = x_ref[...]
    col_sum = jnp.sum(x, axis=-2, keepdims=True, dtype=jnp.float32)   # (1, tn)
    beta = (scale * col_sum).astype(x.dtype)
    o_ref[...] = jnp.maximum(x - beta, 0).astype(o_ref.dtype)


def _colsum_kernel(x_ref, sum_ref, *, m_total, tm):
    # Pass 1 of the tall-M fallback: accumulate per-column f32 sums into the
    # resident (1, tn) output block across the "arbitrary" M grid axis.
    i = pl.program_id(1)

    @pl.when(i == 0)
    def _():
        sum_ref[...] = jnp.zeros_like(sum_ref)

    x = x_ref[...]
    if m_total % tm != 0:
        # Mask the padded rows of the ragged M edge block (their contents are
        # undefined and would otherwise contaminate the column sums).
        rows = jax.lax.broadcasted_iota(jnp.int32, x.shape, 0) + i * tm
        x = jnp.where(rows < m_total, x, jnp.zeros_like(x))
    sum_ref[...] += jnp.sum(x, axis=-2, keepdims=True, dtype=jnp.float32)


def _apply_kernel(x_ref, sum_ref, o_ref, *, scale):
    # Pass 2 of the tall-M fallback: out = max(x - scale * colsum, 0).
    beta = (scale * sum_ref[...]).astype(x_ref.dtype)
    o_ref[...] = jnp.maximum(x_ref[...] - beta, 0).astype(o_ref.dtype)


def _abrelu_global_mean_kernel(x_ref, o_ref, *, scale):
    # <2-D path: beta = alpha * mean(all real elements). Input was zero-padded
    # in the wrapper, so sum() over the padded block equals the real sum and
    # `scale = alpha / true_numel` yields the exact mean.
    x = x_ref[...]
    beta = (scale * jnp.sum(x, dtype=jnp.float32)).astype(x.dtype)
    o_ref[...] = jnp.maximum(x - beta, 0).astype(o_ref.dtype)


# ---------------------------------------------------------------------------
# Generation-aware tile / VMEM selection
# ---------------------------------------------------------------------------

def _tpu_topology():
    """Returns (per-TensorCore VMEM bytes, number of TensorCores per chip)."""
    kind = ""
    try:
        kind = jax.devices()[0].device_kind.lower()
    except Exception:
        pass
    # v7x (and megacore v4/v5p) expose >1 TensorCore worth of parallelism.
    multi_tc = any(tag in kind for tag in ("v7", "7x", "v4", "v5p"))
    num_tc = 2 if multi_tc else 1
    vmem = 64 << 20   # conservative default = v7x per-TC physical VMEM
    try:
        vmem = int(pltpu.get_tpu_info().vmem_capacity_bytes)
    except Exception:
        pass
    if multi_tc:
        # If the API reports the per-chip aggregate, clamp to the per-TC 64 MiB.
        vmem = min(vmem, 64 << 20)
    return vmem, num_tc


def _vmem_limit(vmem_cap):
    # Raise the scoped-VMEM default (16 MiB v5e / 32 MiB v6e, v7x) so wide
    # tiles are accepted; stay well under physical per-TC capacity.
    return min(int(vmem_cap * 0.8), 110 << 20)


def _choose_tn(M, N, dtype, vmem_cap, num_tc):
    """Lane tile width for the single-pass (full-M column block) kernel."""
    itemsize = jnp.dtype(dtype).itemsize
    # Budget for one grid step's double-buffered (input + output) blocks; the
    # kernel keeps only a (1, tn) f32 temporary, so >50% headroom remains for
    # compiler scratch.
    block_budget = int(vmem_cap * 0.45)
    per_lane_bytes = 2 * (itemsize + itemsize) * max(M, 1)   # 2 bufs x (in + out)
    tn = max(128, (block_budget // per_lane_bytes) // 128 * 128)
    # Measured tile-width sweep: 512->1024 gains ~1 pt of roofline, 1024->2048
    # is flat, so cap at 1024 and keep the VMEM for buffering/scratch.
    tn = min(tn, 1024)
    if itemsize < 4 and N >= 256:
        # Keep each row segment of the strided column DMA >= 512 B, as long as
        # the wider block still fits comfortably under the VMEM limit.
        if per_lane_bytes * 256 <= int(vmem_cap * 0.6):
            tn = max(tn, 256)
    if N >= 128:
        # Never wider than the array's whole 128-multiples (the cdiv grid's
        # partial edge block handles the remainder).
        tn = min(tn, max(128, (N // 128) * 128))
        if num_tc >= 2:
            # Multi-TC (v7x): aim for >= 2 grid steps per TensorCore so each
            # core keeps DMA/compute overlap, but never drop below 512 lanes.
            tn = min(tn, max(512, (N // (2 * num_tc)) // 128 * 128))
    else:
        tn = N   # block == full array dim (allowed by the (8,128) rule)
    return tn


def _choose_two_pass_tiles(M, N, dtype, vmem_cap):
    """(tm, tn) for the tall-M two-pass fallback."""
    itemsize = jnp.dtype(dtype).itemsize
    block_budget = int(vmem_cap * 0.45)
    if N >= 128:
        tn = min(256 if itemsize < 4 else 128, max(128, (N // 128) * 128))
    else:
        tn = N
    per_row_bytes = 2 * (itemsize + itemsize) * max(tn, 1)
    tm = max(8, (block_budget // per_row_bytes) // 8 * 8)
    tm = min(tm, 4096)
    if M >= 8:
        tm = min(tm, max(8, (M // 8) * 8))
    else:
        tm = M
    return tm, tn


# ---------------------------------------------------------------------------
# pallas_call builders
# ---------------------------------------------------------------------------

def _ab_relu_2d_single_pass(x, alpha, tn, vmem_cap):
    M, N = x.shape
    itemsize = jnp.dtype(x.dtype).itemsize
    return pl.pallas_call(
        functools.partial(_abrelu_2d_kernel, scale=alpha / M),
        out_shape=jax.ShapeDtypeStruct((M, N), x.dtype),
        grid_spec=pltpu.PrefetchScalarGridSpec(
            num_scalar_prefetch=0,
            grid=(pl.cdiv(N, tn),),
            in_specs=[pl.BlockSpec((M, tn), lambda j: (0, j))],
            out_specs=pl.BlockSpec((M, tn), lambda j: (0, j)),
        ),
        compiler_params=pltpu.CompilerParams(
            dimension_semantics=("parallel",),
            vmem_limit_bytes=_vmem_limit(vmem_cap)),
        cost_estimate=pl.CostEstimate(
            flops=2 * M * N, transcendentals=0,
            bytes_accessed=2 * M * N * itemsize),
    )(x)


def _ab_relu_2d_two_pass(x, alpha, tm, tn, vmem_cap):
    # Tall-M fallback: pass 1 accumulates per-column f32 sums over tiled M,
    # pass 2 re-reads X and applies max(x - beta, 0).
    M, N = x.shape
    itemsize = jnp.dtype(x.dtype).itemsize
    vmem_limit = _vmem_limit(vmem_cap)
    nt, mt = pl.cdiv(N, tn), pl.cdiv(M, tm)

    col_sum = pl.pallas_call(
        functools.partial(_colsum_kernel, m_total=M, tm=tm),
        out_shape=jax.ShapeDtypeStruct((1, N), jnp.float32),
        grid_spec=pltpu.PrefetchScalarGridSpec(
            num_scalar_prefetch=0,
            grid=(nt, mt),                       # reduction (M) axis last
            in_specs=[pl.BlockSpec((tm, tn), lambda j, i: (i, j))],
            out_specs=pl.BlockSpec((1, tn), lambda j, i: (0, j)),
        ),
        compiler_params=pltpu.CompilerParams(
            dimension_semantics=("parallel", "arbitrary"),
            vmem_limit_bytes=vmem_limit),
        cost_estimate=pl.CostEstimate(
            flops=M * N, transcendentals=0,
            bytes_accessed=M * N * itemsize + N * 4),
    )(x)

    return pl.pallas_call(
        functools.partial(_apply_kernel, scale=alpha / M),
        out_shape=jax.ShapeDtypeStruct((M, N), x.dtype),
        grid_spec=pltpu.PrefetchScalarGridSpec(
            num_scalar_prefetch=0,
            grid=(nt, mt),
            in_specs=[pl.BlockSpec((tm, tn), lambda j, i: (i, j)),
                      pl.BlockSpec((1, tn), lambda j, i: (0, j))],
            out_specs=pl.BlockSpec((tm, tn), lambda j, i: (i, j)),
        ),
        compiler_params=pltpu.CompilerParams(
            dimension_semantics=("parallel", "parallel"),
            vmem_limit_bytes=vmem_limit),
        cost_estimate=pl.CostEstimate(
            flops=2 * M * N, transcendentals=0,
            bytes_accessed=2 * M * N * itemsize + N * 4),
    )(x, col_sum)


# ---------------------------------------------------------------------------
# Public entry point
# ---------------------------------------------------------------------------

def ab_relu(x, alpha: float = 1.0, *, tn=None, force_two_pass=False,
            two_pass_tiles=None):
    orig_shape = x.shape

    if x.ndim < 2:
        flat = x.reshape(-1)
        n = int(flat.shape[0])
        # Lane/sublane-dense layout: zero-pad to a multiple of 128 and reshape
        # to (rows, 128) so each vreg's 8 sublanes x 128 lanes are all used.
        # TODO(synk): fuse the pad/slice into the kernel (iota mask) to drop
        # the two wrapper-side HBM copies; negligible for small 1-D activations.
        padded = pl.cdiv(max(n, 1), 128) * 128
        flat = jnp.pad(flat, (0, padded - n))
        x2 = flat.reshape(padded // 128, 128)
        out = pl.pallas_call(
            functools.partial(_abrelu_global_mean_kernel, scale=alpha / max(n, 1)),
            out_shape=jax.ShapeDtypeStruct(x2.shape, x.dtype),
        )(x2)
        return out.reshape(-1)[:n].reshape(orig_shape)

    # TODO(synk): rank>2 inputs don't broadcast in the PyTorch reference
    # ((..., M, N) - (..., N) shape-mismatches except in degenerate cases), so
    # only the 2-D case is implemented here.
    assert x.ndim == 2, "ABReLU reference only broadcasts cleanly for 2-D input"
    M, N = x.shape

    vmem_cap, num_tc = _tpu_topology()
    itemsize = jnp.dtype(x.dtype).itemsize
    block_budget = int(vmem_cap * 0.45)
    # Can a double-buffered (in + out) full-M block of minimum lane width fit?
    min_tn = min(N, 128)
    full_m_fits = 2 * (itemsize + itemsize) * M * max(min_tn, 1) <= block_budget

    if force_two_pass or not full_m_fits:
        if two_pass_tiles is not None:
            tm, tpn = two_pass_tiles
        else:
            tm, tpn = _choose_two_pass_tiles(M, N, x.dtype, vmem_cap)
        return _ab_relu_2d_two_pass(x, alpha, tm, tpn, vmem_cap)

    if tn is None:
        tn = _choose_tn(M, N, x.dtype, vmem_cap, num_tc)
    return _ab_relu_2d_single_pass(x, alpha, tn, vmem_cap)


# ---------------------------------------------------------------------------
# Reference + tests
# ---------------------------------------------------------------------------

def _ab_relu_ref(x, alpha=1.0):
    if x.ndim < 2:
        beta = alpha * jnp.mean(x)
    else:
        beta = alpha * jnp.mean(x, axis=-2)
    return jnp.clip(x - beta, 0.0, None)


if __name__ == "__main__":
    key = jax.random.PRNGKey(0)

    # 2-D case: (seq=16, hidden=128)
    x = jax.random.normal(key, (16, 128), dtype=jnp.float32)
    out = jax.block_until_ready(ab_relu(x, alpha=1.0))
    ref = _ab_relu_ref(x, alpha=1.0)
    assert out.shape == x.shape and out.dtype == x.dtype
    assert jnp.allclose(out, ref, atol=1e-5, rtol=1e-5)

    # Ragged N (exercises the cdiv grid / partial edge block): (24, 200)
    k2, k3 = jax.random.split(key)
    xr = jax.random.normal(k2, (24, 200), dtype=jnp.float32)
    outr = jax.block_until_ready(ab_relu(xr, alpha=0.7))
    assert jnp.allclose(outr, _ab_relu_ref(xr, alpha=0.7), atol=1e-5, rtol=1e-5)

    # bf16 input (f32-accumulated column sum, native-dtype subtract/ReLU)
    xb = jax.random.normal(k3, (16, 256), dtype=jnp.bfloat16)
    outb = jax.block_until_ready(ab_relu(xb, alpha=1.0))
    assert outb.dtype == jnp.bfloat16
    assert jnp.allclose(outb.astype(jnp.float32),
                        _ab_relu_ref(xb.astype(jnp.float32), alpha=1.0),
                        atol=3e-2, rtol=3e-2)

    # Tall-M two-pass fallback, forced with small tiles so both kernels and the
    # ragged-M mask path are exercised on small shapes: (200, 384), tm=64.
    k4 = jax.random.fold_in(key, 4)
    xt = jax.random.normal(k4, (200, 384), dtype=jnp.float32)
    outt = jax.block_until_ready(
        ab_relu(xt, alpha=1.0, force_two_pass=True, two_pass_tiles=(64, 128)))
    assert jnp.allclose(outt, _ab_relu_ref(xt, alpha=1.0), atol=1e-5, rtol=1e-5)

    # 1-D docstring example: [1, -2, 0, 3] -> [0.5, 0, 0, 2.5]
    x1 = jnp.array([1.0, -2.0, 0.0, 3.0], dtype=jnp.float32)
    out1 = jax.block_until_ready(ab_relu(x1, alpha=1.0))
    assert jnp.allclose(out1, jnp.array([0.5, 0.0, 0.0, 2.5]), atol=1e-6)

    print("KERNEL_OK")
</pallas_src>

<mosaic_0001>
module attributes {stable_mosaic.version = 11 : i64} {
  func.func @_abrelu_2d_kernel(%arg0: i32, %arg1: memref<16x128xf32, #tpu.memory_space<vmem>>, %arg2: memref<16x128xf32, #tpu.memory_space<vmem>>) attributes {dimension_semantics = [#tpu.dimension_semantics<parallel>], iteration_bounds = array<i64: 1>, scalar_prefetch = 0 : i64, scratch_operands = 0 : i64, tpu.core_type = #tpu.core_type<tc>, window_params = [{transform_indices = @transform_0, window_bounds = array<i64: 16, 128>}, {transform_indices = @transform_1, window_bounds = array<i64: 16, 128>}]} {
    %c0 = arith.constant 0 : index
    %c0_0 = arith.constant 0 : index
    %0 = vector.load %arg1[%c0, %c0_0] : memref<16x128xf32, #tpu.memory_space<vmem>>, vector<16x128xf32>
    %cst = arith.constant dense<0.000000e+00> : vector<128xf32>
    %1 = vector.multi_reduction <add>, %0, %cst [0] : vector<16x128xf32> to vector<128xf32>
    %2 = vector.shape_cast %1 : vector<128xf32> to vector<1x128xf32>
    %cst_1 = arith.constant 6.250000e-02 : f32
    %3 = vector.broadcast %cst_1 : f32 to vector<1x128xf32>
    %4 = arith.mulf %3, %2 : vector<1x128xf32>
    %5 = vector.broadcast %4 : vector<1x128xf32> to vector<16x128xf32>
    %6 = arith.subf %0, %5 : vector<16x128xf32>
    %cst_2 = arith.constant 0.000000e+00 : f32
    %7 = vector.broadcast %cst_2 : f32 to vector<16x128xf32>
    %8 = arith.maximumf %6, %7 : vector<16x128xf32>
    %c0_3 = arith.constant 0 : index
    %c0_4 = arith.constant 0 : index
    %9 = vector.load %arg2[%c0_3, %c0_4] : memref<16x128xf32, #tpu.memory_space<vmem>>, vector<16x128xf32>
    tpu.vector_store %arg2[%c0_3, %c0_4], %8 {strides = array<i32>} : memref<16x128xf32, #tpu.memory_space<vmem>>, vector<16x128xf32>,
    return
  }
  func.func @transform_0(%arg0: i32) -> (i32, i32) {
    %c0_i32 = arith.constant 0 : i32
    %c0_i32_0 = arith.constant 0 : i32
    return %c0_i32, %arg0 : i32, i32
  }
  func.func @transform_1(%arg0: i32) -> (i32, i32) {
    %c0_i32 = arith.constant 0 : i32
    %c0_i32_0 = arith.constant 0 : i32
    return %c0_i32, %arg0 : i32, i32
  }
}

</mosaic_0001>

<bundles_post_ra>
// kernel: tpu_custom_call.1
= control target key start
LH: loop header
LB: loop body
LE: loop exit
PB: predicated region body
PF: predicated region fallthrough
CT: control target
= control target key end

     0   :  { %6 = vsyncpa [#allocation3], 0  ;;  %s136_s0 = inlined_call_operand.hbm [shape: f32[16,128], index: 0, kind: input, shape index: {}]   ;;  %s137_s1 = inlined_call_operand.hbm [shape: f32[16,128], index: 1, kind: output, shape index: {}]  }
   0x1   :  { %7 = vsyncpa [#allocation4], 0  ;;  %s12_s8 = sshll.u32 %s136_s0, 4  ;;  %s116_s9 = smov [#allocation2]   ;;  %s13_s8 = int_to_ptr.hbm [resolvable:$true] %s12_s8 }
   0x2   :  { %s14_s10 = sshll.u32 %s116_s9, 4  ;;  %s117_s11 = smov 128   ;;  %s15_s10 = int_to_ptr.vmem [resolvable:$true] %s14_s10 }
   0x3   :  { %s118_s12 = smov 8  }
   0x4   :  { %20 = dma.hbm_to_vmem [thread:$0]  %s13_s8, 256, %s15_s10, [#allocation3], %s117_s11, %s117_s11, %s118_s12  }
   0x5   :  { %112 = dma.done.wait [#allocation3], 256  }
   0x6   :  { %113 = vsyncadd [#allocation3], 4294967040  ;;  %v25_v0 = vld [vmem:[#allocation2] sm:$0xff]  ;;  %v26_v1 = vld [vmem:[#allocation2 + $0x8] sm:$0xff]  ;;  %s119_s0 = smov [#allocation5]   ;;  %s47_s16 = sshll.u32 %s137_s1, 4  ;;  %s48_s16 = int_to_ptr.hbm [resolvable:$true] %s47_s16 }
   0x7   :  { %v27_v2 = vadd.f32 %v26_v1, %v25_v0  ;;  %s45_s13 = sshll.u32 %s119_s0, 4  ;;  %s46_s13 = int_to_ptr.vmem [resolvable:$true] %s45_s13 }
   0x9   :  { %v28_v3 = vrot.slane %v27_v2, 4 }
   0xb   :  { %v29_v4 = vadd.f32 %v28_v3, %v27_v2 }
   0xd   :  { %v30_v5 = vrot.slane %v29_v4, 2 }
   0xf   :  { %v31_v6 = vadd.f32 %v30_v5, %v29_v4 }
  0x11   :  { %v32_v7 = vrot.slane %v31_v6, 1 }
  0x13   :  { %v33_v8 = vadd.f32 %v32_v7, %v31_v6 }
  0x15   :  { %v34_v9 = vmul.f32 0.0625, %v33_v8 }
  0x17   :  { %v35_v10 = vsub.f32 %v25_v0, %v34_v9  ;;  %v36_v11 = vsub.f32 %v26_v1, %v34_v9 }
  0x19   :  { %v37_v12 = vmax.f32 %v35_v10, 0.0  ;;  %v38_v13 = vmax.f32 %v36_v11, 0.0 }
  0x1b   :  { %39 = vst [vmem:[#allocation5] sm:$0xff] %v37_v12 }
  0x1c   :  { %40 = vst [vmem:[#allocation5 + $0x8] sm:$0xff] %v38_v13 }
  0x1d   :  { %53 = dma.vmem_to_hbm [thread:$0]  %s46_s13, 256, %s48_s16, [#allocation4], %s117_s11, %s117_s11, %s118_s12  }
  0x1e   :  { %114 = dma.done.wait [#allocation4], 256  }
  0x1f   :  { %115 = vsyncadd [#allocation4], 4294967040 }
  0x20   :  { %58 = vsyncpa [#allocation3], 1 }
  0x21   :  { %59 = vsyncpa [#allocation4], 1 }

</bundles_post_ra>
